<compile_context>
chip_gen: v7x
topology: tpu7x:2x2x1
jax: 0.10.0
libtpu: 0.0.40
codegen_flags: <defaults>
</compile_context>

<pallas_src>
import functools
import math

import jax
import jax.numpy as jnp
from jax.experimental import pallas as pl
from jax.experimental.pallas import tpu as pltpu


def _round_up(n: int, m: int) -> int:
    return ((n + m - 1) // m) * m


def _vmem_capacity_bytes() -> int:
    try:
        info = pltpu.get_tpu_info()
        return int(getattr(info, "vmem_capacity_bytes", 64 << 20))
    except Exception:
        return 64 << 20  # conservative (v7x-sized) fallback


def _vmem_estimate(tb: int, d_pad: int, d_emb_pad: int, io_bytes: int,
                   w_bytes: int = 2) -> int:
    """Rough VMEM footprint for one grid step (conservative)."""
    row_tiles = 2 * 4 * tb * d_pad * io_bytes        # double-buffered x, t, out, emb
    weights = 2 * 2 * d_pad * d_emb_pad * w_bytes    # w_in + w_out (count 2 buffers)
    params = 2 * 4 * max(d_pad, d_emb_pad) * 4       # gamma/beta/b_in/b_out rows
    scratch = 2 * tb * d_emb_pad * 4 + 3 * tb * d_pad * 4   # f32 intermediates
    return row_tiles + weights + params + scratch + (2 << 20)


def _choose_tiling(batch: int, d_pad: int, d_emb_pad: int, io_bytes: int,
                   block_b):
    """Pick (TB, B_pad, n_tiles) that fits VMEM, wastes little padding and gives
    >= 2 grid steps (so the batch axis can shard across TCs on v7x)."""
    cap = _vmem_capacity_bytes()
    budget = int(cap * 0.75)
    if block_b is None:
        # v5e/v6e (128 MiB VMEM): large tiles ~86% of HBM roofline.
        # v7x (64 MiB) / unknown: stay small to avoid VMEM over-subscription.
        block_b = 1024 if cap >= (100 << 20) else 256
    tb_cap = max(8, block_b)
    while tb_cap > 8 and _vmem_estimate(tb_cap, d_pad, d_emb_pad, io_bytes) > budget:
        tb_cap //= 2
    # TODO(synk): if resident bf16 weights alone approach the budget (huge
    # D_in/D_emb on v7x), add a D_emb grid axis with an accumulator instead.

    n_tiles = max(1, pl.cdiv(batch, tb_cap))
    if n_tiles == 1 and batch > 8:
        n_tiles = 2                      # keep both v7x TensorCores busy
    tb = _round_up(pl.cdiv(batch, n_tiles), 8)   # minimal batch-padding waste
    b_pad = n_tiles * tb
    return tb, b_pad, n_tiles, cap


def residual_block_kernel(x_ref, t_ref, gamma_ref, beta_ref,
                          w_in_ref, b_in_ref, w_out_ref, b_out_ref,
                          out_ref, emb_ref, *, dim_input):
    f32 = jnp.float32
    x = x_ref[...].astype(f32)            # (TB, D_pad); padded lanes are zero
    t = t_ref[...].astype(f32)

    # ---- LayerNorm(x + t) over the true feature width (eps = 1e-5, affine) ----
    xt = x + t
    inv_d = 1.0 / dim_input
    s1 = jnp.sum(xt, axis=-1, keepdims=True)          # padded lanes contribute 0
    s2 = jnp.sum(xt * xt, axis=-1, keepdims=True)
    mean = s1 * inv_d
    var = jnp.maximum(s2 * inv_d - mean * mean, 0.0)   # single-pass variance
    # gamma folded into the normalization scale; padded gamma/beta lanes are zero
    # so padded lanes of xn stay exactly zero.
    scale = gamma_ref[...] * jax.lax.rsqrt(var + 1e-5)
    xn = (xt - mean) * scale + beta_ref[...]

    # ---- linear_in + ReLU (bf16 operands on the MXU, f32 accumulate) ----
    h = jnp.dot(xn.astype(w_in_ref.dtype), w_in_ref[...],
                preferred_element_type=jnp.float32) + b_in_ref[...]
    h = jnp.maximum(h, 0.0)

    # dropout with p = 0.0 (module default) is the identity; skipped.
    # TODO(synk): if p_dropout > 0 were required, build the keep-mask in-kernel
    #             with pltpu.prng_seed + pltpu.prng_random_bits.

    # ---- linear_out (padded output columns are zero by construction) ----
    y = jnp.dot(h.astype(w_out_ref.dtype), w_out_ref[...],
                preferred_element_type=jnp.float32) + b_out_ref[...]

    out_ref[...] = (x + y).astype(out_ref.dtype)   # lane-dense stores
    emb_ref[...] = y.astype(emb_ref.dtype)


def prepare_residual_block_params(gamma, beta, w_in, b_in, w_out, b_out,
                                  weight_dtype=jnp.bfloat16):
    """Pad + cast parameters ONCE (hoisted out of the per-forward path).

    w_in: (D_in, D_emb) = W_in^T of torch Linear; w_out: (D_emb, D_in) = W_out^T.
    Padded rows/cols are exactly zero — the kernel relies on that invariant.
    """
    f32 = jnp.float32
    d_in = gamma.shape[0]
    d_emb = b_in.shape[0]
    d_pad = _round_up(d_in, 128)
    d_emb_pad = _round_up(d_emb, 128)

    gp = jnp.zeros((1, d_pad), f32).at[:, :d_in].set(gamma.reshape(1, -1).astype(f32))
    bp = jnp.zeros((1, d_pad), f32).at[:, :d_in].set(beta.reshape(1, -1).astype(f32))
    w_in_p = jnp.zeros((d_pad, d_emb_pad), weight_dtype).at[:d_in, :d_emb].set(
        w_in.astype(weight_dtype))
    b_in_p = jnp.zeros((1, d_emb_pad), f32).at[:, :d_emb].set(
        b_in.reshape(1, -1).astype(f32))
    w_out_p = jnp.zeros((d_emb_pad, d_pad), weight_dtype).at[:d_emb, :d_in].set(
        w_out.astype(weight_dtype))
    b_out_p = jnp.zeros((1, d_pad), f32).at[:, :d_in].set(
        b_out.reshape(1, -1).astype(f32))
    return gp, bp, w_in_p, b_in_p, w_out_p, b_out_p


def residual_block(x, t, gamma_p, beta_p, w_in_p, b_in_p, w_out_p, b_out_p,
                   *, dim_input, block_b=None):
    """x, t: (B, dim_input). Remaining args come from prepare_residual_block_params."""
    batch, d_in = x.shape
    assert d_in == dim_input
    d_pad = gamma_p.shape[-1]
    d_emb_pad = w_in_p.shape[-1]
    io_dtype = x.dtype                       # pass bf16 x/t to halve activation HBM traffic
    io_bytes = jnp.dtype(io_dtype).itemsize

    tb, b_pad, n_tiles, cap = _choose_tiling(batch, d_pad, d_emb_pad, io_bytes, block_b)

    # Skip the pad/slice round-trip entirely when shapes are already aligned.
    needs_pad = (b_pad != batch) or (d_pad != d_in)
    if needs_pad:
        xp = jnp.zeros((b_pad, d_pad), io_dtype).at[:batch, :d_in].set(x)
        tp = jnp.zeros((b_pad, d_pad), io_dtype).at[:batch, :d_in].set(t)
    else:
        xp, tp = x, t

    row_spec = pl.BlockSpec((tb, d_pad), lambda i: (i, 0))       # pipelined row tiles
    const = lambda shape: pl.BlockSpec(shape, lambda i: (0, 0))  # VMEM-resident params

    est = _vmem_estimate(tb, d_pad, d_emb_pad, io_bytes)
    vmem_limit = int(min(max(est, 32 << 20), cap - (4 << 20)))

    kernel = functools.partial(residual_block_kernel, dim_input=dim_input)

    out, emb = pl.pallas_call(
        kernel,
        out_shape=(
            jax.ShapeDtypeStruct((b_pad, d_pad), io_dtype),
            jax.ShapeDtypeStruct((b_pad, d_pad), io_dtype),
        ),
        grid_spec=pltpu.PrefetchScalarGridSpec(
            num_scalar_prefetch=0,
            grid=(n_tiles,),
            in_specs=[
                row_spec,                       # x
                row_spec,                       # t
                const((1, d_pad)),              # gamma
                const((1, d_pad)),              # beta
                const((d_pad, d_emb_pad)),      # w_in  (bf16)
                const((1, d_emb_pad)),          # b_in
                const((d_emb_pad, d_pad)),      # w_out (bf16)
                const((1, d_pad)),              # b_out
            ],
            out_specs=(row_spec, row_spec),
        ),
        compiler_params=pltpu.CompilerParams(
            dimension_semantics=("parallel",),   # batch axis shards across TCs on v7x
            vmem_limit_bytes=vmem_limit,
        ),
    )(xp, tp, gamma_p, beta_p, w_in_p, b_in_p, w_out_p, b_out_p)

    if needs_pad:
        out = out[:batch, :d_in]
        emb = emb[:batch, :d_in]
    return out, emb


def _reference(x, t, gamma, beta, w_in, b_in, w_out, b_out):
    xt = x + t
    mean = jnp.mean(xt, axis=-1, keepdims=True)
    var = jnp.mean((xt - mean) ** 2, axis=-1, keepdims=True)
    xn = (xt - mean) / jnp.sqrt(var + 1e-5) * gamma + beta
    h = jnp.maximum(xn @ w_in + b_in, 0.0)
    y = h @ w_out + b_out
    return x + y, y


def _make_case(key, batch, d_in, d_emb):
    kx, kt, kg, kb, kwi, kbi, kwo, kbo = jax.random.split(key, 8)
    x = jax.random.normal(kx, (batch, d_in), dtype=jnp.float32)
    t = jax.random.normal(kt, (batch, d_in), dtype=jnp.float32)
    gamma = 1.0 + 0.1 * jax.random.normal(kg, (d_in,), dtype=jnp.float32)
    beta = 0.1 * jax.random.normal(kb, (d_in,), dtype=jnp.float32)
    lim_in = 1.0 / math.sqrt(d_in)
    lim_out = 1.0 / math.sqrt(d_emb)
    w_in = jax.random.uniform(kwi, (d_in, d_emb), jnp.float32, -lim_in, lim_in)
    b_in = jax.random.uniform(kbi, (d_emb,), jnp.float32, -lim_in, lim_in)
    w_out = jax.random.uniform(kwo, (d_emb, d_in), jnp.float32, -lim_out, lim_out)
    b_out = jax.random.uniform(kbo, (d_in,), jnp.float32, -lim_out, lim_out)
    return x, t, gamma, beta, w_in, b_in, w_out, b_out


def _run_and_check(case, dim_input):
    x, t, gamma, beta, w_in, b_in, w_out, b_out = case
    params = prepare_residual_block_params(gamma, beta, w_in, b_in, w_out, b_out)
    rb = jax.jit(functools.partial(residual_block, dim_input=dim_input))
    out, emb = rb(x, t, *params)
    out, emb = jax.block_until_ready((out, emb))
    ref_out, ref_emb = _reference(x, t, gamma, beta, w_in, b_in, w_out, b_out)
    # bf16 MXU operands / bf16 weights (f32 accumulate) => bf16-level tolerance.
    assert jnp.allclose(out, ref_out, atol=2e-2, rtol=2e-2), "out mismatch"
    assert jnp.allclose(emb, ref_emb, atol=2e-2, rtol=2e-2), "emb mismatch"


if __name__ == "__main__":
    key = jax.random.PRNGKey(0)
    k1, k2 = jax.random.split(key)

    # Case 1: unaligned shapes — exercises batch padding (10 -> 16) and lane
    # padding (32 -> 128) with the module-default dim_embedding = 128.
    _run_and_check(_make_case(k1, batch=10, d_in=32, d_emb=128), dim_input=32)

    # Case 2: aligned shapes — exercises the no-pad fast path (no activation
    # pad/slice round-trip, caller arrays go straight into pallas_call).
    _run_and_check(_make_case(k2, batch=16, d_in=128, d_emb=128), dim_input=128)

    print("KERNEL_OK")
</pallas_src>

<mosaic_0001>
module attributes {stable_mosaic.version = 11 : i64} {
  func.func @residual_block_kernel(%arg0: i32, %arg1: memref<8x128xf32, #tpu.memory_space<vmem>>, %arg2: memref<8x128xf32, #tpu.memory_space<vmem>>, %arg3: memref<1x128xf32, #tpu.memory_space<vmem>>, %arg4: memref<1x128xf32, #tpu.memory_space<vmem>>, %arg5: memref<128x128xbf16, #tpu.memory_space<vmem>>, %arg6: memref<1x128xf32, #tpu.memory_space<vmem>>, %arg7: memref<128x128xbf16, #tpu.memory_space<vmem>>, %arg8: memref<1x128xf32, #tpu.memory_space<vmem>>, %arg9: memref<8x128xf32, #tpu.memory_space<vmem>>, %arg10: memref<8x128xf32, #tpu.memory_space<vmem>>) attributes {dimension_semantics = [#tpu.dimension_semantics<parallel>], iteration_bounds = array<i64: 2>, scalar_prefetch = 0 : i64, scratch_operands = 0 : i64, tpu.core_type = #tpu.core_type<tc>, window_params = [{transform_indices = @transform_0, window_bounds = array<i64: 8, 128>}, {transform_indices = @transform_1, window_bounds = array<i64: 8, 128>}, {pipeline_mode = #tpu.pipeline_mode<synchronous>, transform_indices = @transform_2, window_bounds = array<i64: 1, 128>}, {pipeline_mode = #tpu.pipeline_mode<synchronous>, transform_indices = @transform_3, window_bounds = array<i64: 1, 128>}, {pipeline_mode = #tpu.pipeline_mode<synchronous>, transform_indices = @transform_4, window_bounds = array<i64: 128, 128>}, {pipeline_mode = #tpu.pipeline_mode<synchronous>, transform_indices = @transform_5, window_bounds = array<i64: 1, 128>}, {pipeline_mode = #tpu.pipeline_mode<synchronous>, transform_indices = @transform_6, window_bounds = array<i64: 128, 128>}, {pipeline_mode = #tpu.pipeline_mode<synchronous>, transform_indices = @transform_7, window_bounds = array<i64: 1, 128>}, {transform_indices = @transform_8, window_bounds = array<i64: 8, 128>}, {transform_indices = @transform_9, window_bounds = array<i64: 8, 128>}]} {
    %c0 = arith.constant 0 : index
    %c0_0 = arith.constant 0 : index
    %0 = vector.load %arg1[%c0, %c0_0] : memref<8x128xf32, #tpu.memory_space<vmem>>, vector<8x128xf32>
    %c0_1 = arith.constant 0 : index
    %c0_2 = arith.constant 0 : index
    %1 = vector.load %arg2[%c0_1, %c0_2] : memref<8x128xf32, #tpu.memory_space<vmem>>, vector<8x128xf32>
    %2 = arith.addf %0, %1 : vector<8x128xf32>
    %cst = arith.constant dense<0.000000e+00> : vector<8xf32>
    %3 = vector.multi_reduction <add>, %2, %cst [1] : vector<8x128xf32> to vector<8xf32>
    %4 = vector.shape_cast %3 : vector<8xf32> to vector<8x1xf32>
    %5 = arith.mulf %2, %2 : vector<8x128xf32>
    %cst_3 = arith.constant dense<0.000000e+00> : vector<8xf32>
    %6 = vector.multi_reduction <add>, %5, %cst_3 [1] : vector<8x128xf32> to vector<8xf32>
    %7 = vector.shape_cast %6 : vector<8xf32> to vector<8x1xf32>
    %cst_4 = arith.constant 3.125000e-02 : f32
    %8 = vector.broadcast %cst_4 : f32 to vector<8x1xf32>
    %9 = arith.mulf %4, %8 : vector<8x1xf32>
    %cst_5 = arith.constant 3.125000e-02 : f32
    %10 = vector.broadcast %cst_5 : f32 to vector<8x1xf32>
    %11 = arith.mulf %7, %10 : vector<8x1xf32>
    %12 = arith.mulf %9, %9 : vector<8x1xf32>
    %13 = arith.subf %11, %12 : vector<8x1xf32>
    %cst_6 = arith.constant 0.000000e+00 : f32
    %14 = vector.broadcast %cst_6 : f32 to vector<8x1xf32>
    %15 = arith.maximumf %13, %14 : vector<8x1xf32>
    %c0_7 = arith.constant 0 : index
    %c0_8 = arith.constant 0 : index
    %16 = vector.load %arg3[%c0_7, %c0_8] : memref<1x128xf32, #tpu.memory_space<vmem>>, vector<1x128xf32>
    %cst_9 = arith.constant 9.99999974E-6 : f32
    %17 = vector.broadcast %cst_9 : f32 to vector<8x1xf32>
    %18 = arith.addf %15, %17 : vector<8x1xf32>
    %19 = math.rsqrt %18 : vector<8x1xf32>
    %20 = vector.broadcast %16 : vector<1x128xf32> to vector<8x128xf32>
    %21 = vector.broadcast %19 : vector<8x1xf32> to vector<8x128xf32>
    %22 = arith.mulf %20, %21 : vector<8x128xf32>
    %23 = vector.broadcast %9 : vector<8x1xf32> to vector<8x128xf32>
    %24 = arith.subf %2, %23 : vector<8x128xf32>
    %25 = arith.mulf %24, %22 : vector<8x128xf32>
    %c0_10 = arith.constant 0 : index
    %c0_11 = arith.constant 0 : index
    %26 = vector.load %arg4[%c0_10, %c0_11] : memref<1x128xf32, #tpu.memory_space<vmem>>, vector<1x128xf32>
    %27 = vector.broadcast %26 : vector<1x128xf32> to vector<8x128xf32>
    %28 = arith.addf %25, %27 : vector<8x128xf32>
    %29 = arith.truncf %28 : vector<8x128xf32> to vector<8x128xbf16>
    %c0_12 = arith.constant 0 : index
    %c0_13 = arith.constant 0 : index
    %30 = vector.load %arg5[%c0_12, %c0_13] : memref<128x128xbf16, #tpu.memory_space<vmem>>, vector<128x128xbf16>
    %cst_14 = arith.constant dense<0.000000e+00> : vector<8x128xf32>
    %31 = tpu.matmul %29, %30, %cst_14 {dimension_numbers = #tpu.dot_dimension_numbers<[1], [0], [0], [1], [0, 0, 1, 1], [], []>} : vector<8x128xbf16>, vector<128x128xbf16>, vector<8x128xf32> -> vector<8x128xf32>
    %c0_15 = arith.constant 0 : index
    %c0_16 = arith.constant 0 : index
    %32 = vector.load %arg6[%c0_15, %c0_16] : memref<1x128xf32, #tpu.memory_space<vmem>>, vector<1x128xf32>
    %33 = vector.broadcast %32 : vector<1x128xf32> to vector<8x128xf32>
    %34 = arith.addf %31, %33 : vector<8x128xf32>
    %cst_17 = arith.constant 0.000000e+00 : f32
    %35 = vector.broadcast %cst_17 : f32 to vector<8x128xf32>
    %36 = arith.maximumf %34, %35 : vector<8x128xf32>
    %37 = arith.truncf %36 : vector<8x128xf32> to vector<8x128xbf16>
    %c0_18 = arith.constant 0 : index
    %c0_19 = arith.constant 0 : index
    %38 = vector.load %arg7[%c0_18, %c0_19] : memref<128x128xbf16, #tpu.memory_space<vmem>>, vector<128x128xbf16>
    %cst_20 = arith.constant dense<0.000000e+00> : vector<8x128xf32>
    %39 = tpu.matmul %37, %38, %cst_20 {dimension_numbers = #tpu.dot_dimension_numbers<[1], [0], [0], [1], [0, 0, 1, 1], [], []>} : vector<8x128xbf16>, vector<128x128xbf16>, vector<8x128xf32> -> vector<8x128xf32>
    %c0_21 = arith.constant 0 : index
    %c0_22 = arith.constant 0 : index
    %40 = vector.load %arg8[%c0_21, %c0_22] : memref<1x128xf32, #tpu.memory_space<vmem>>, vector<1x128xf32>
    %41 = vector.broadcast %40 : vector<1x128xf32> to vector<8x128xf32>
    %42 = arith.addf %39, %41 : vector<8x128xf32>
    %43 = arith.addf %0, %42 : vector<8x128xf32>
    %c0_23 = arith.constant 0 : index
    %c0_24 = arith.constant 0 : index
    %44 = vector.load %arg9[%c0_23, %c0_24] : memref<8x128xf32, #tpu.memory_space<vmem>>, vector<8x128xf32>
    tpu.vector_store %arg9[%c0_23, %c0_24], %43 {strides = array<i32>} : memref<8x128xf32, #tpu.memory_space<vmem>>, vector<8x128xf32>,
    %c0_25 = arith.constant 0 : index
    %c0_26 = arith.constant 0 : index
    %45 = vector.load %arg10[%c0_25, %c0_26] : memref<8x128xf32, #tpu.memory_space<vmem>>, vector<8x128xf32>
    tpu.vector_store %arg10[%c0_25, %c0_26], %42 {strides = array<i32>} : memref<8x128xf32, #tpu.memory_space<vmem>>, vector<8x128xf32>,
    return
  }
  func.func @transform_0(%arg0: i32) -> (i32, i32) {
    %c0_i32 = arith.constant 0 : i32
    %c0_i32_0 = arith.constant 0 : i32
    return %arg0, %c0_i32 : i32, i32
  }
  func.func @transform_1(%arg0: i32) -> (i32, i32) {
    %c0_i32 = arith.constant 0 : i32
    %c0_i32_0 = arith.constant 0 : i32
    return %arg0, %c0_i32 : i32, i32
  }
  func.func @transform_2(%arg0: i32) -> (i32, i32) {
    %c0_i32 = arith.constant 0 : i32
    %c0_i32_0 = arith.constant 0 : i32
    %c0_i32_1 = arith.constant 0 : i32
    return %c0_i32, %c0_i32_0 : i32, i32
  }
  func.func @transform_3(%arg0: i32) -> (i32, i32) {
    %c0_i32 = arith.constant 0 : i32
    %c0_i32_0 = arith.constant 0 : i32
    %c0_i32_1 = arith.constant 0 : i32
    return %c0_i32, %c0_i32_0 : i32, i32
  }
  func.func @transform_4(%arg0: i32) -> (i32, i32) {
    %c0_i32 = arith.constant 0 : i32
    %c0_i32_0 = arith.constant 0 : i32
    %c0_i32_1 = arith.constant 0 : i32
    return %c0_i32, %c0_i32_0 : i32, i32
  }
  func.func @transform_5(%arg0: i32) -> (i32, i32) {
    %c0_i32 = arith.constant 0 : i32
    %c0_i32_0 = arith.constant 0 : i32
    %c0_i32_1 = arith.constant 0 : i32
    return %c0_i32, %c0_i32_0 : i32, i32
  }
  func.func @transform_6(%arg0: i32) -> (i32, i32) {
    %c0_i32 = arith.constant 0 : i32
    %c0_i32_0 = arith.constant 0 : i32
    %c0_i32_1 = arith.constant 0 : i32
    return %c0_i32, %c0_i32_0 : i32, i32
  }
  func.func @transform_7(%arg0: i32) -> (i32, i32) {
    %c0_i32 = arith.constant 0 : i32
    %c0_i32_0 = arith.constant 0 : i32
    %c0_i32_1 = arith.constant 0 : i32
    return %c0_i32, %c0_i32_0 : i32, i32
  }
  func.func @transform_8(%arg0: i32) -> (i32, i32) {
    %c0_i32 = arith.constant 0 : i32
    %c0_i32_0 = arith.constant 0 : i32
    return %arg0, %c0_i32 : i32, i32
  }
  func.func @transform_9(%arg0: i32) -> (i32, i32) {
    %c0_i32 = arith.constant 0 : i32
    %c0_i32_0 = arith.constant 0 : i32
    return %arg0, %c0_i32 : i32, i32
  }
}

</mosaic_0001>

<bundles_post_ra>
// kernel: residual_block.1
= control target key start
LH: loop header
LB: loop body
LE: loop exit
PB: predicated region body
PF: predicated region fallthrough
CT: control target
= control target key end

     0   :  { %s1375_s0 = inlined_call_operand.vmem [shape: f32[16,128], index: 0, kind: input, shape index: {}]   ;;  %s1376_s1 = inlined_call_operand.vmem [shape: f32[16,128], index: 1, kind: input, shape index: {}]   ;;  %s1377_s2 = inlined_call_operand.vmem [shape: f32[1,128], index: 2, kind: input, shape index: {}]   ;;  %s1378_s3 = inlined_call_operand.vmem [shape: f32[1,128], index: 3, kind: input, shape index: {}]   ;;  %s1379_s4 = inlined_call_operand.vmem [shape: bf16[128,128], index: 4, kind: input, shape index: {}]   ;;  %s1380_s5 = inlined_call_operand.vmem [shape: f32[1,128], index: 5, kind: input, shape index: {}]   ;;  %s1381_s6 = inlined_call_operand.hbm [shape: bf16[128,128], index: 6, kind: input, shape index: {}]   ;;  %s1382_s7 = inlined_call_operand.vmem [shape: f32[1,128], index: 7, kind: input, shape index: {}]   ;;  %s1383_s8 = inlined_call_operand.hbm [shape: f32[16,128], index: 8, kind: output, shape index: {0}]   ;;  %s1384_s9 = inlined_call_operand.hbm [shape: f32[16,128], index: 9, kind: output, shape index: {1}]  }
   0x1   :  { %1388 = sst [smem:[#allocation11_spill]] %s1375_s0 }
   0x2   :  { %1389 = sst [smem:[#allocation12_spill]] %s1376_s1 }
   0x3   :  { %15 = vsyncpa [#allocation3], 0 }
   0x4   :  { %16 = vsyncpa [#allocation4], 0 }
   0x5   :  { %18 = vsyncpa [#allocation4 + $0x1], 0 }
   0x6   :  { %19 = vsyncpa [#allocation7], 0 }
   0x7   :  { %21 = vsyncpa [#allocation7 + $0x1], 0  ;;  %s1136_s30 = smov 0   ;;  %s1138_s10 = smov 0  }
   0x8   :  { %s1140_s11 = smov 0   ;;  %s1142_s12 = smov 0  }
   0x9 LB: > { %s1157_s13 = sadd.s32 4294967295, %s1077_s12   ;;  %s780_s14 = sadd.s32 4294967294, %s1077_s12   ;;  %s1077_s12 = sphi %s1142_s12, %s1404_s12   ;;  %s1073_s11 = sphi %s1140_s11, %s1403_s11   ;;  %s1069_s10 = sphi %s1138_s10, %s1402_s10   ;;  %s1065_s30 = sphi %s1136_s30, %s1401_s30  }
   0xa   : > { %s1161_s15 = sadd.s32 1, %s1077_s12   ;;  %s212_s16 = sadd.s32 1, %s1073_s11 }
   0xb   : > { %s209_s17 = ssub.s32 %s1077_s12, %s1161_s15  ;;  %p222_p0 = scmp.ne.s32.totalorder %s1073_s11, %s1069_s10 }
   0xc   : > { %p210_p1 = scmp.eq.s32.totalorder %s209_s17, 0  ;;  %p223_p2 = scmp.eq.s32.totalorder %s1157_s13, 1 }
   0xd   : > { %p228_p3 = scmp.ne.s32.totalorder %s1069_s10, %s1065_s30  ;;  %p229_p4 = scmp.eq.s32.totalorder %s780_s14, 1 }
   0xe   : > { %s1172_s18 = scalar_select %p210_p1, %s1073_s11, %s212_s16  }
   0xf   : > { %p1174_p5 = por %p223_p2, %p222_p0  ;;  %p1178_p6 = por %p229_p4, %p228_p3 }
  0x10   : > { %p781_p7 = scmp.ge.s32.totalorder %s1077_s12, 1  ;;  %p262_p8 = scmp.lt.s32.totalorder %s1077_s12, 3 }
  0x11   : > { %s1390_s19 = scalar_select %p1174_p5, 1, 0 }
  0x12   : > { %s1391_s20 = scalar_select %p1178_p6, 1, 0 }
  0x13   : > { %p1385_p9 = scmp.eq.s32.totalorder %s1157_s13, 0  ;;  %p1185_p10 = pnand %p781_p7, %p262_p8 }
  0x14   : > { %s1079_s22 = smov [#allocation2]   ;;  %s951_s27 = scalar_lea.hbm %s1381_s6, 1024 }
  0x15   : > { %s1392_s21 = scalar_select %p1185_p10, 1, 0 }
  0x16   : > { %s286_s23 = sshll.u32 %s1079_s22, 4  ;;  %p882_p11 = pneg %p1185_p10  ;;  %s287_s23 = int_to_ptr.vmem [resolvable:$true] %s286_s23 }
  0x17   : > { %p952_p13 = scmp.ne.s32.totalorder %s1381_s6, %s951_s27  ;;  %p958_p3 = scmp.lt.u32.totalorder %s951_s27, %s1381_s6 }
  0x18   : > { %p1193_p12 = pnand %p1385_p9, %p882_p11 }
  0x1a   : > { %p953_p0 = pneg %p1193_p12 }
  0x1c   : > { %p954_p1 = pnand %p953_p0, %p952_p13 }
  0x1e   : > { %p955_p2 = pneg %p954_p1 }
  0x20   : > { %p960_p4 = pnand %p958_p3, %p955_p2 }
  0x22   : > { %963 = shalt.err (!%p960_p4)
}
  0x23   : > { %s964_s17 = scalar_lea.vmem %s287_s23, 1024  ;;  %p972_p9 = scmp.lt.s32.totalorder %s287_s23, %s287_s23 }
  0x24   : > { %p965_p7 = scmp.ne.s32.totalorder %s287_s23, %s964_s17  ;;  %p973_p6 = scmp.lt.s32.totalorder %s964_s17, %s964_s17 }
  0x26   : > { %p967_p8 = pnand %p965_p7, %p953_p0  ;;  %p974_p5 = por %p973_p6, %p972_p9 }
  0x28   : > { %p968_p11 = pneg %p967_p8 }
  0x2a   : > { %p975_p10 = pnand %p974_p5, %p968_p11 }
  0x2c   : > { %978 = shalt.err (!%p975_p10)
}
  0x2d   : > { %s1080_s22 = smov 64   ;;  %s1081_s25 = smov 4  }
  0x2e   : > { %885 = dma.hbm_to_vmem [thread:$0]  (!%p1193_p12), %s1381_s6, 1024, %s287_s23, [#allocation3], %s1080_s22, %s1080_s22, %s1081_s25  }
  0x2f   : > { %p1394_p13 = scmp.ne.s32.totalorder %s1392_s21, 0 }
  0x30   : > { %p1395_p1 = scmp.eq.s32.totalorder (!%p1394_p13), %s1157_s13, 0 }
  0x31   : > { %319 = sbr.rel (%p1394_p13) target bundleno = 710 (0x2c6), region = 52 }
  0x38   : > { %1052 = dma.done.wait (%p1395_p1), [#allocation3], 1024   ;;  %p1396_p0 = pmov %p1395_p1 }
  0x39   : > { %p363_p5 = scmp.lt.s32.totalorder %s1157_s13, 1  ;;  %v1082_v0 = vmov 0.0   ;;  %s1397_s0 = sld [smem:[#allocation11_spill]]  ;;  %v933_v5 = vld [vmem:[%s1379_s4] sm:$0xff]   ;;  %v934_v6 = vld [vmem:[%s1379_s4 + $0x8] sm:$0xff]   ;;  %v935_v7 = vld [vmem:[%s1379_s4 + $0x10] sm:$0xff]  }
  0x3a   : > { %1054 = vsyncadd (%p1396_p0), [#allocation3], 4294966272  ;;  %834 = vmatprep.subr.bf16.mxu0 %v1082_v0  ;;  %854 = vmatprep.subr.bf16.mxu1 %v1082_v0  ;;  %s1398_s1 = sld [smem:[#allocation12_spill]]  ;;  %v936_v8 = vld [vmem:[%s1379_s4 + $0x18] sm:$0xff]   ;;  %v937_v9 = vld [vmem:[%s1379_s4 + $0x20] sm:$0xff]   ;;  %vm1083_vm0 = vmmov 0  }
  0x3b   : > { %s364_s24 = scalar_select %p363_p5, %s1157_s13, 1  ;;  %835 = vmatpush3.bf16.msra.mxu0 %v933_v5  ;;  %850 = vmatprep.mubr.msk.bf16.mxu0 %vm1083_vm0, %v1082_v0  ;;  %v938_v10 = vld [vmem:[%s1379_s4 + $0x28] sm:$0xff]   ;;  %v939_v11 = vld [vmem:[%s1379_s4 + $0x30] sm:$0xff]   ;;  %v940_v12 = vld [vmem:[%s1379_s4 + $0x38] sm:$0xff]  }
  0x3c   : > { %836 = vmatprep.subr.bf16.mxu0 %v1082_v0  ;;  %870 = vmatprep.mubr.msk.bf16.mxu1 %vm1083_vm0, %v1082_v0  ;;  %v941_v13 = vld [vmem:[#allocation2] sm:$0xff]   ;;  %v942_v14 = vld [vmem:[#allocation2 + $0x8] sm:$0xff]   ;;  %v943_v15 = vld [vmem:[#allocation2 + $0x10] sm:$0xff]   ;;  %s1288_s16 = sand.u32 1, %s1069_s10   ;;  %s812_s26 = sshll.u32 %s1157_s13, 7 }
  0x3d   : > { %s788_s27 = sshll.u32 %s364_s24, 3  ;;  %855 = vmatpush3.bf16.msra.mxu1 %v941_v13  ;;  %v944_v16 = vld [vmem:[#allocation2 + $0x18] sm:$0xff]   ;;  %v945_v17 = vld [vmem:[#allocation2 + $0x20] sm:$0xff]   ;;  %v946_v18 = vld [vmem:[#allocation2 + $0x28] sm:$0xff]   ;;  %s1301_s14 = scalar_lea.hbm %s1384_s9, %s812_s26 }
  0x3e   : > { %856 = vmatprep.subr.bf16.mxu1 %v1082_v0  ;;  %v790_v27 = vld [vmem:[%s1377_s2] ss:$0 sm:$0xff]  ;;  %v947_v35 = vld [vmem:[#allocation2 + $0x30] sm:$0xff]   ;;  %v948_v36 = vld [vmem:[#allocation2 + $0x38] sm:$0xff]   ;;  %s1309_s22 = scalar_lea.hbm %s1383_s8, %s812_s26  ;;  %s639_s25 = scalar_lea.sflag [#allocation7], %s1288_s16 }
  0x3f   : > { %s366_s21 = scalar_lea.vmem %s1397_s0, %s788_s27  ;;  %837 = vmatpush3.bf16.msra.mxu0 %v934_v6  ;;  %v791_v31 = vld [vmem:[%s1378_s3] ss:$0 sm:$0xff]  ;;  %p1399_p9 = scmp.ne.s32.totalorder %s1390_s19, 0 }
  0x40   : > { %s370_s17 = scalar_lea.vmem %s1398_s1, %s788_s27  ;;  %v1229_v1 = vld [vmem:[%s366_s21] sm:$0xff]  ;;  %838 = vmatprep.subr.bf16.mxu0 %v1082_v0  ;;  %s1084_s21 = smov [#allocation6]  }
  0x41   : > { %v373_v2 = vld [vmem:[%s370_s17] sm:$0xff]  ;;  %857 = vmatpush3.bf16.msra.mxu1 %v942_v14  ;;  %s786_s17 = sshll.u32 %s1288_s16, 3  ;;  %s983_s0 = sshll.u32 %s1084_s21, 4  ;;  %s984_s0 = int_to_ptr.vmem [resolvable:$false] %s983_s0 }
  0x42   : > { %v1232_v3 = vadd.f32 %v373_v2, %v1229_v1  ;;  %858 = vmatprep.subr.bf16.mxu1 %v1082_v0  ;;  %v792_v37 = vld [vmem:[%s1380_s5] ss:$0 sm:$0xff]  ;;  %s362_s28 = scalar_lea.vmem [#allocation6], %s786_s17  ;;  %s1295_s27 = scalar_lea.vmem [#allocation5], %s786_s17 }
  0x43   : > { %839 = vmatpush3.bf16.msra.mxu0 %v935_v7  ;;  %v801_v45 = vld [vmem:[%s1382_s7] ss:$0 sm:$0xff]  ;;  %s665_s24 = sshll.u32 %s362_s28, 4  ;;  %s652_s23 = sshll.u32 %s1295_s27, 4  ;;  %s1303_s24 = int_to_ptr.vmem [resolvable:$true] %s665_s24  ;;  %s1311_s23 = int_to_ptr.vmem [resolvable:$true] %s652_s23 }
  0x44   : > { %375 = vadd.xlane.f32.xlu0 %v1232_v3  ;;  %v377_v4 = vmul.f32 %v1232_v3, %v1232_v3  ;;  %840 = vmatprep.subr.bf16.mxu0 %v1082_v0  ;;  %s979_s29 = scalar_lea.vmem %s1303_s24, 128  ;;  %s985_s1 = scalar_lea.vmem %s984_s0, 256 }
  0x45   : > { %859 = vmatpush3.bf16.msra.mxu1 %v943_v15  ;;  %p980_p6 = scmp.ne.s32.totalorder %s1303_s24, %s979_s29  ;;  %p986_p2 = scmp.lt.s32.totalorder %s1303_s24, %s984_s0 }
  0x46   : > { %860 = vmatprep.subr.bf16.mxu1 %v1082_v0  ;;  %p987_p3 = scmp.lt.s32.totalorder %s985_s1, %s979_s29 }
  0x47   : > { %841 = vmatpush3.bf16.msra.mxu0 %v936_v8  ;;  %p981_p10 = pnand %p980_p6, %p1399_p9 }
  0x48   : > { %378 = vadd.xlane.f32.xlu0 %v377_v4  ;;  %842 = vmatprep.subr.bf16.mxu0 %v1082_v0  ;;  %p988_p4 = por %p987_p3, %p986_p2 }
  0x49   : > { %861 = vmatpush3.bf16.msra.mxu1 %v944_v16  ;;  %p982_p12 = pneg %p981_p10 }
  0x4a   : > { %862 = vmatprep.subr.bf16.mxu1 %v1082_v0 }
  0x4b   : > { %843 = vmatpush3.bf16.msra.mxu0 %v937_v9  ;;  %p989_p7 = pnand %p988_p4, %p982_p12 }
  0x4c   : > { %844 = vmatprep.subr.bf16.mxu0 %v1082_v0 }
  0x4d   : > { %863 = vmatpush3.bf16.msra.mxu1 %v945_v17 }
  0x4e   : > { %864 = vmatprep.subr.bf16.mxu1 %v1082_v0 }
  0x4f   : > { %845 = vmatpush3.bf16.msra.mxu0 %v938_v10 }
  0x50   : > { %846 = vmatprep.subr.bf16.mxu0 %v1082_v0 }
  0x51   : > { %865 = vmatpush3.bf16.msra.mxu1 %v946_v18 }
  0x52   : > { %866 = vmatprep.subr.bf16.mxu1 %v1082_v0 }
  0x53   : > { %847 = vmatpush3.bf16.msra.mxu0 %v939_v11 }
  0x54   : > { %848 = vmatprep.subr.bf16.mxu0 %v1082_v0 }
  0x55   : > { %867 = vmatpush3.bf16.msra.mxu1 %v947_v35 }
  0x56   : > { %868 = vmatprep.subr.bf16.mxu1 %v1082_v0 }
  0x57   : > { %849 = vmatpush3.bf16.msra.mxu0 %v940_v12 }
  0x59   : > { %869 = vmatpush3.bf16.msra.mxu1 %v948_v36 }
  0xd1   : > { %v376_v19 = vpop.xlane.xlu0 %375 }
  0xd2   : > { %v380_v20 = vmul.f32 0.03125, %v376_v19 }
  0xd4   : > { %v382_v22 = vmul.f32 %v380_v20, %v380_v20  ;;  %v395_v29 = vsub.f32 %v1232_v3, %v380_v20 }
  0xd5   : > { %v379_v21 = vpop.xlane.xlu0 %378 }
  0xd6   : > { %v381_v23 = vmul.f32 0.03125, %v379_v21 }
  0xd8   : > { %v383_v24 = vsub.f32 %v381_v23, %v382_v22 }
  0xda   : > { %v384_v25 = vmax.f32 %v383_v24, 0.0 }
  0xdc   : > { %v386_v26 = vadd.f32 1e-05, %v384_v25 }
  0xde   : > { %949 = vrsqrt.f32 %v386_v26 }
  0xe8   : > { %v950_v28 = vpop.eup %949 }
  0xe9   : > { %v394_v30 = vmul.f32 %v950_v28, %v790_v27 }
  0xeb   : > { %v396_v32 = vmul.f32 %v395_v29, %v394_v30 }
  0xed   : > { %v404_v33 = vadd.f32 %v791_v31, %v396_v32 }
  0xef   : > { %v405_v34 = vpack.c.bf16 %v404_v33, %v404_v33 }
  0xf1   : > { %851 = vmatmul.mubr.bf16.vlgmr.msra.gmra.mrb[0].mxu0 %v405_v34 }
 0x1c4   : > { %v511_v38 = vpop.f32.mrb[0].mxu0 }
 0x1c5   : > { %v512_v39 = vadd.f32 %v792_v37, %v511_v38  ;;  %v852_v40 = vpop.f32.mrb[1].mxu0 }
 0x1c6   : > { %v514_v41 = vpop.f32.mrb[2].mxu0 }
 0x1c7   : > { %v517_v42 = vmax.f32 %v512_v39, 0.0  ;;  %v853_v43 = vpop.f32.mrb[3].mxu0 }
 0x1c9   : > { %v518_v44 = vpack.c.bf16 %v517_v42, %v517_v42 }
 0x1cb   : > { %871 = vmatmul.mubr.bf16.vlgmr.msra.gmra.mrb[0].mxu1 %v518_v44 }
 0x29e   : > { %v624_v46 = vpop.f32.mrb[0].mxu1 }
 0x29f   : > { %v625_v47 = vadd.f32 %v801_v45, %v624_v46  ;;  %v872_v48 = vpop.f32.mrb[1].mxu1 }
 0x2a0   : > { %v627_v49 = vpop.f32.mrb[2].mxu1 }
 0x2a1   : > { %v630_v50 = vadd.f32 %v625_v47, %v1229_v1  ;;  %632 = vst [vmem:[%s362_s28] sm:$0xff] %v625_v47  ;;  %v873_v51 = vpop.f32.mrb[3].mxu1 }
 0x2a2   : > { %992 = shalt.err (!%p989_p7)
}
 0x2a3   : > { %s993_s26 = scalar_lea.hbm %s1301_s14, 128  ;;  %s997_s17 = scalar_lea.hbm %s1384_s9, 256 }
 0x2a4   : > { %p994_p8 = scmp.ne.s32.totalorder %s1301_s14, %s993_s26  ;;  %p998_p1 = scmp.lt.u32.totalorder %s1301_s14, %s1384_s9 }
 0x2a5   : > { %p999_p0 = scmp.lt.u32.totalorder %s997_s17, %s993_s26  ;;  %p1001_p6 = scmp.lt.u32.totalorder %s993_s26, %s1301_s14 }
 0x2a6   : > { %p995_p11 = pnand %p994_p8, %p1399_p9 }
 0x2a7   : > { %p1000_p5 = por %p999_p0, %p998_p1 }
 0x2a8   : > { %p996_p13 = pneg %p995_p11 }
 0x2a9   : > { %p1002_p10 = por %p1001_p6, %p1000_p5 }
 0x2ab   : > { %p1003_p12 = pnand %p1002_p10, %p996_p13 }
 0x2ad   : > { %1006 = shalt.err (!%p1003_p12)
}
 0x2ae   : > { %879 = dma.vmem_to_hbm [thread:$0]  (%p1399_p9), %s1303_s24, 128, %s1301_s14, %s639_s25   ;;  %631 = vst [vmem:[%s1295_s27] sm:$0xff] %v630_v50 }
 0x2af   : > { %s634_s1 = scalar_lea.sflag [#allocation4], %s1288_s16  ;;  %s1007_s29 = scalar_lea.vmem %s1311_s23, 128 }
 0x2b0   : > { %p1008_p2 = scmp.ne.s32.totalorder %s1311_s23, %s1007_s29  ;;  %s1085_s26 = smov [#allocation5]  }
 0x2b1   : > { %s1011_s28 = sshll.u32 %s1085_s26, 4  ;;  %s1012_s28 = int_to_ptr.vmem [resolvable:$false] %s1011_s28 }
 0x2b2   : > { %p1009_p3 = pnand %p1008_p2, %p1399_p9  ;;  %s1013_s13 = scalar_lea.vmem %s1012_s28, 256 }
 0x2b3   : > { %p1014_p7 = scmp.lt.s32.totalorder %s1311_s23, %s1012_s28  ;;  %p1015_p8 = scmp.lt.s32.totalorder %s1013_s13, %s1007_s29 }
 0x2b4   : > { %p1010_p4 = pneg %p1009_p3 }
 0x2b5   : > { %p1016_p11 = por %p1015_p8, %p1014_p7 }
 0x2b7   : > { %p1017_p13 = pnand %p1016_p11, %p1010_p4 }
 0x2b9   : > { %1020 = shalt.err (!%p1017_p13)
}
 0x2ba   : > { %s1021_s16 = scalar_lea.hbm %s1309_s22, 128  ;;  %s1025_s14 = scalar_lea.hbm %s1383_s8, 256 }
 0x2bb   : > { %p1022_p1 = scmp.ne.s32.totalorder %s1309_s22, %s1021_s16  ;;  %p1026_p6 = scmp.lt.u32.totalorder %s1309_s22, %s1383_s8 }
 0x2bc   : > { %p1027_p10 = scmp.lt.u32.totalorder %s1025_s14, %s1021_s16  ;;  %p1029_p2 = scmp.lt.u32.totalorder %s1021_s16, %s1309_s22 }
 0x2bd   : > { %p1023_p0 = pnand %p1022_p1, %p1399_p9 }
 0x2be   : > { %p1028_p12 = por %p1027_p10, %p1026_p6 }
 0x2bf   : > { %p1024_p5 = pneg %p1023_p0 }
 0x2c0   : > { %p1030_p3 = por %p1029_p2, %p1028_p12 }
 0x2c2   : > { %p1031_p4 = pnand %p1030_p3, %p1024_p5 }
 0x2c4   : > { %1034 = shalt.err (!%p1031_p4)
}
 0x2c5   : > { %878 = dma.vmem_to_hbm [thread:$0]  (%p1399_p9), %s1311_s23, 128, %s1309_s22, %s634_s1  }
 0x2c6 PF: > { %p895_p7 = scmp.ge.s32.totalorder %s1077_s12, 2  ;;  %s677_s21 = sand.u32 1, %s1065_s30  }
 0x2c7   : > { %p1400_p8 = scmp.ne.s32.totalorder %s1391_s20, 0  ;;  %s678_s0 = scalar_lea.sflag [#allocation4], %s677_s21 }
 0x2c9   : > { %p887_p11 = pnand %p895_p7, %p1400_p8 }
 0x2cb   : > { %1056 = dma.done.wait (!%p887_p11), %s678_s0, 128  }
 0x2cc   : > { %1058 = vsyncadd (!%p887_p11), %s678_s0, 4294967168  ;;  %s687_s29 = scalar_lea.sflag [#allocation7], %s677_s21 }
 0x2cd   : > { %1060 = dma.done.wait (!%p887_p11), %s687_s29, 128  }
 0x2ce   : > { %1062 = vsyncadd (!%p887_p11), %s687_s29, 4294967168  ;;  %p24_p9 = scmp.ge.s32.totalorder %s1161_s15, 4   ;;  %s1401_s30 = smov %s1069_s10 }
 0x2cf   : > { %s1402_s10 = smov %s1073_s11  ;;  %s1403_s11 = smov %s1172_s18 }
 0x2d0   : > { %s1404_s12 = smov %s1161_s15  ;;  %26 = sbr.rel (!%p24_p9) target bundleno = 9 (0x9), region = 112 }
 0x2d7   :  { %692 = vsyncpa [#allocation3], 1 }
 0x2d8   :  { %694 = vsyncpa [#allocation3 + $0x1], 1 }
 0x2d9   :  { %695 = vsyncpa [#allocation4], 1 }
 0x2da   :  { %697 = vsyncpa [#allocation4 + $0x1], 1 }
 0x2db   :  { %698 = vsyncpa [#allocation7], 1 }
 0x2dc   :  { %700 = vsyncpa [#allocation7 + $0x1], 1 }

</bundles_post_ra>
